<compile_context>
chip_gen: v7x
topology: tpu7x:2x2x1
jax: 0.10.0
libtpu: 0.0.40
codegen_flags: <defaults>
</compile_context>

<pallas_src>
import math

import jax
import jax.numpy as jnp
from jax.experimental import pallas as pl
from jax.experimental.pallas import tpu as pltpu


# ----------------------------- Pallas kernel ------------------------------ #
def _sage_kernel(a_ref, xk_ref, xs_ref, w1_ref, w2_ref, b_ref, out_ref, acc_ref):
    k = pl.program_id(1)

    @pl.when(k == 0)
    def _init():
        acc_ref[...] = jnp.zeros_like(acc_ref)

    # int8 0/1 adjacency tile -> bf16 on the VPU (hidden under the DMA), then MXU.
    a = a_ref[...].astype(jnp.bfloat16)                       # (tile_n, tile_k)

    # X is augmented with a trailing ones column, so the last accumulator lane is
    # the in-degree (row sum of A): one MXU push does aggregation AND degrees.
    acc_ref[...] += jnp.dot(a, xk_ref[...],                   # (tile_n, F_in+1)
                            preferred_element_type=jnp.float32)

    @pl.when(k == pl.num_programs(1) - 1)
    def _finalize():
        acc = acc_ref[...]                                    # (tile_n, F_in+1) f32
        f_in = acc.shape[-1] - 1
        deg = acc[:, f_in:]                                   # (tile_n, 1) exact ints
        agg = acc[:, :f_in]                                   # (tile_n, F_in)

        # Exact divide (once per dst tile -> negligible). Guard deg == 0
        # (isolated nodes): the PyTorch module would produce inf/nan there; the
        # demo graph has self-loops so deg >= 1 and the guard is a no-op.
        ah = (agg / jnp.maximum(deg, 1.0)).astype(jnp.bfloat16)

        x_self = xs_ref[:, :f_in]                             # (tile_n, F_in) bf16

        # out = X @ W1 + ah @ W2 + (b1 + b2)   -- two small bf16 MXU pushes,
        # f32 accumulation, 128-lane-dense output tile (unmasked stores).
        out = jnp.dot(x_self, w1_ref[...], preferred_element_type=jnp.float32)
        out = out + jnp.dot(ah, w2_ref[...], preferred_element_type=jnp.float32)
        out_ref[...] = (out + b_ref[...]).astype(out_ref.dtype)


# ------------------------------- wrapper ----------------------------------- #
def graphsage_forward(adj, feat, w1, b1, w2, b2, *, tile_n=512, tile_k=512):
    """adj: [N, N] dense adjacency (A[v, u] = 1 iff edge u->v), ideally int8/uint8.
    feat: [N, F_in] f32. w1/w2: [F_in, F_out] (transposed vs. torch Linear.weight).
    b1/b2: [1, F_out]."""
    N, F_in = feat.shape
    F_out = w1.shape[1]
    assert adj.shape == (N, N)

    # Keep A 1 byte/elem in HBM (0/1 exact). Pass it as int8 to avoid any cast pass.
    if adj.dtype not in (jnp.int8, jnp.uint8):
        adj = adj.astype(jnp.int8)

    tile_n = min(tile_n, N)
    tile_k = min(tile_k, N)
    assert N % tile_n == 0 and N % tile_k == 0

    # Features in bf16, augmented with a ones column -> MXU also produces degrees.
    f_aug = F_in + 1
    feat_aug = jnp.concatenate(
        [feat.astype(jnp.bfloat16), jnp.ones((N, 1), jnp.bfloat16)], axis=-1)

    # Weights in bf16, zero-padded to >= 128 output lanes (lane-dense out tile).
    f_out_pad = max(128, ((F_out + 127) // 128) * 128)
    pad = f_out_pad - F_out
    w1p = jnp.pad(w1.astype(jnp.bfloat16), ((0, 0), (0, pad)))
    w2p = jnp.pad(w2.astype(jnp.bfloat16), ((0, 0), (0, pad)))
    bp = jnp.pad((b1 + b2).astype(jnp.float32), ((0, 0), (0, pad)))

    grid = (N // tile_n, N // tile_k)

    # v5e's 16 MiB scoped-VMEM default only needs raising for very large tiles.
    vmem_limit = (64 << 20) if max(tile_n, tile_k) >= 1024 else None

    out_padded = pl.pallas_call(
        _sage_kernel,
        out_shape=jax.ShapeDtypeStruct((N, f_out_pad), jnp.float32),
        grid_spec=pltpu.PrefetchScalarGridSpec(
            num_scalar_prefetch=0,
            grid=grid,
            in_specs=[
                pl.BlockSpec((tile_n, tile_k), lambda i, k: (i, k)),   # A tile (int8)
                pl.BlockSpec((tile_k, f_aug), lambda i, k: (k, 0)),    # X_aug source tile
                pl.BlockSpec((tile_n, f_aug), lambda i, k: (i, 0)),    # X_aug self tile
                pl.BlockSpec((F_in, f_out_pad), lambda i, k: (0, 0)),  # W1 (bf16, padded)
                pl.BlockSpec((F_in, f_out_pad), lambda i, k: (0, 0)),  # W2 (bf16, padded)
                pl.BlockSpec((1, f_out_pad), lambda i, k: (0, 0)),     # b1 + b2 (f32)
            ],
            out_specs=pl.BlockSpec((tile_n, f_out_pad), lambda i, k: (i, 0)),
            scratch_shapes=[
                pltpu.VMEM((tile_n, f_aug), jnp.float32),  # [agg | deg] accumulator
            ],
        ),
        compiler_params=pltpu.CompilerParams(
            dimension_semantics=("parallel", "arbitrary"),
            vmem_limit_bytes=vmem_limit),
    )(adj, feat_aug, feat_aug, w1p, w2p, bp)

    return out_padded[:, :F_out] if pad else out_padded


# ------------------------------- reference -------------------------------- #
def graphsage_reference(adj, feat, w1, b1, w2, b2):
    adj = adj.astype(jnp.float32)
    deg = jnp.sum(adj, axis=1, keepdims=True)
    ah = (adj @ feat) / deg
    return feat @ w1 + b1 + ah @ w2 + b2


# --------------------------------- main ------------------------------------ #
if __name__ == "__main__":
    N = 256          # number of graph nodes
    IN_FEATS = 32
    OUT_FEATS = 32

    key = jax.random.PRNGKey(0)
    k_adj, k_feat, kw1, kb1, kw2, kb2 = jax.random.split(key, 6)

    # Random sparse-ish graph built directly as int8 dense adjacency (1 B/elem in
    # HBM, no cast pass); add self-loops so in_deg >= 1.
    adj = (jax.random.uniform(k_adj, (N, N)) < 0.15).astype(jnp.int8)
    adj = jnp.maximum(adj, jnp.eye(N, dtype=jnp.int8))

    feat = jax.random.normal(k_feat, (N, IN_FEATS), dtype=jnp.float32)

    # Parameter init matching reset_parameters(): uniform(-stdv, stdv) with
    # stdv = 1/sqrt(in_feats). Stored transposed: [F_in, F_out].
    stdv = 1.0 / math.sqrt(IN_FEATS)
    w1 = jax.random.uniform(kw1, (IN_FEATS, OUT_FEATS), minval=-stdv, maxval=stdv,
                            dtype=jnp.float32)
    b1 = jax.random.uniform(kb1, (1, OUT_FEATS), minval=-stdv, maxval=stdv,
                            dtype=jnp.float32)
    w2 = jax.random.uniform(kw2, (IN_FEATS, OUT_FEATS), minval=-stdv, maxval=stdv,
                            dtype=jnp.float32)
    b2 = jax.random.uniform(kb2, (1, OUT_FEATS), minval=-stdv, maxval=stdv,
                            dtype=jnp.float32)

    out = graphsage_forward(adj, feat, w1, b1, w2, b2)
    out = jax.block_until_ready(out)

    ref = graphsage_reference(adj, feat, w1, b1, w2, b2)
    assert out.shape == (N, OUT_FEATS)
    # bf16 feature / weight streaming vs. pure-f32 reference: errors are O(1e-3)
    # absolute on O(1)-magnitude outputs (degrees are exact; divide is exact).
    max_err = float(jnp.max(jnp.abs(out - ref)))
    assert jnp.allclose(out, ref, atol=2e-2, rtol=2e-2), max_err

    print("KERNEL_OK")
</pallas_src>

<mosaic_0001>
module attributes {stable_mosaic.version = 11 : i64} {
  func.func @_sage_kernel(%arg0: i32, %arg1: i32, %arg2: memref<256x256xi8, #tpu.memory_space<vmem>>, %arg3: memref<256x33xbf16, #tpu.memory_space<vmem>>, %arg4: memref<256x33xbf16, #tpu.memory_space<vmem>>, %arg5: memref<32x128xbf16, #tpu.memory_space<vmem>>, %arg6: memref<32x128xbf16, #tpu.memory_space<vmem>>, %arg7: memref<1x128xf32, #tpu.memory_space<vmem>>, %arg8: memref<256x128xf32, #tpu.memory_space<vmem>>, %arg9: memref<256x33xf32, #tpu.memory_space<vmem>>) attributes {dimension_semantics = [#tpu.dimension_semantics<parallel>, #tpu.dimension_semantics<arbitrary>], iteration_bounds = array<i64: 1, 1>, scalar_prefetch = 0 : i64, scratch_operands = 1 : i64, tpu.core_type = #tpu.core_type<tc>, window_params = [{transform_indices = @transform_0, window_bounds = array<i64: 256, 256>}, {transform_indices = @transform_1, window_bounds = array<i64: 256, 33>}, {transform_indices = @transform_2, window_bounds = array<i64: 256, 33>}, {pipeline_mode = #tpu.pipeline_mode<synchronous>, transform_indices = @transform_3, window_bounds = array<i64: 32, 128>}, {pipeline_mode = #tpu.pipeline_mode<synchronous>, transform_indices = @transform_4, window_bounds = array<i64: 32, 128>}, {pipeline_mode = #tpu.pipeline_mode<synchronous>, transform_indices = @transform_5, window_bounds = array<i64: 1, 128>}, {transform_indices = @transform_6, window_bounds = array<i64: 256, 128>}]} {
    %c0_i32 = arith.constant 0 : i32
    %0 = arith.cmpi eq, %arg1, %c0_i32 : i32
    %1 = arith.extui %0 : i1 to i32
    %c0_i32_0 = arith.constant 0 : i32
    %2 = arith.cmpi ne, %1, %c0_i32_0 : i32
    scf.if %2 {
      %cst_10 = arith.constant 0.000000e+00 : f32
      %13 = vector.broadcast %cst_10 : f32 to vector<256x33xf32>
      %c0_11 = arith.constant 0 : index
      %c0_12 = arith.constant 0 : index
      %14 = vector.load %arg9[%c0_11, %c0_12] : memref<256x33xf32, #tpu.memory_space<vmem>>, vector<256x33xf32>
      tpu.vector_store %arg9[%c0_11, %c0_12], %13 {strides = array<i32>} : memref<256x33xf32, #tpu.memory_space<vmem>>, vector<256x33xf32>,
    } else {
    }
    %c0 = arith.constant 0 : index
    %c0_1 = arith.constant 0 : index
    %3 = vector.load %arg2[%c0, %c0_1] : memref<256x256xi8, #tpu.memory_space<vmem>>, vector<256x256xi8>
    %4 = arith.sitofp %3 : vector<256x256xi8> to vector<256x256xbf16>
    %c0_2 = arith.constant 0 : index
    %c0_3 = arith.constant 0 : index
    %5 = vector.load %arg9[%c0_2, %c0_3] : memref<256x33xf32, #tpu.memory_space<vmem>>, vector<256x33xf32>
    %c0_4 = arith.constant 0 : index
    %c0_5 = arith.constant 0 : index
    %6 = vector.load %arg3[%c0_4, %c0_5] : memref<256x33xbf16, #tpu.memory_space<vmem>>, vector<256x33xbf16>
    %cst = arith.constant dense<0.000000e+00> : vector<256x33xf32>
    %7 = tpu.matmul %4, %6, %cst {dimension_numbers = #tpu.dot_dimension_numbers<[1], [0], [0], [1], [0, 0, 1, 1], [], []>} : vector<256x256xbf16>, vector<256x33xbf16>, vector<256x33xf32> -> vector<256x33xf32>
    %8 = arith.addf %5, %7 : vector<256x33xf32>
    %c0_6 = arith.constant 0 : index
    %c0_7 = arith.constant 0 : index
    %9 = vector.load %arg9[%c0_6, %c0_7] : memref<256x33xf32, #tpu.memory_space<vmem>>, vector<256x33xf32>
    tpu.vector_store %arg9[%c0_6, %c0_7], %8 {strides = array<i32>} : memref<256x33xf32, #tpu.memory_space<vmem>>, vector<256x33xf32>,
    %c0_i32_8 = arith.constant 0 : i32
    %10 = arith.cmpi eq, %arg1, %c0_i32_8 : i32
    %11 = arith.extui %10 : i1 to i32
    %c0_i32_9 = arith.constant 0 : i32
    %12 = arith.cmpi ne, %11, %c0_i32_9 : i32
    scf.if %12 {
      %c0_10 = arith.constant 0 : index
      %c0_11 = arith.constant 0 : index
      %13 = vector.load %arg9[%c0_10, %c0_11] : memref<256x33xf32, #tpu.memory_space<vmem>>, vector<256x33xf32>
      %14 = vector.extract_strided_slice %13 {offsets = [0, 32], sizes = [256, 1], strides = [1, 1]} : vector<256x33xf32> to vector<256x1xf32>
      %15 = vector.extract_strided_slice %13 {offsets = [0, 0], sizes = [256, 32], strides = [1, 1]} : vector<256x33xf32> to vector<256x32xf32>
      %cst_12 = arith.constant 1.000000e+00 : f32
      %16 = vector.broadcast %cst_12 : f32 to vector<256x1xf32>
      %17 = arith.maximumf %14, %16 : vector<256x1xf32>
      %18 = vector.broadcast %17 : vector<256x1xf32> to vector<256x32xf32>
      %19 = arith.divf %15, %18 : vector<256x32xf32>
      %20 = arith.truncf %19 : vector<256x32xf32> to vector<256x32xbf16>
      %c0_13 = arith.constant 0 : index
      %c0_14 = arith.constant 0 : index
      %21 = vector.load %arg4[%c0_13, %c0_14] : memref<256x33xbf16, #tpu.memory_space<vmem>>, vector<256x32xbf16>
      %c0_15 = arith.constant 0 : index
      %c0_16 = arith.constant 0 : index
      %22 = vector.load %arg5[%c0_15, %c0_16] : memref<32x128xbf16, #tpu.memory_space<vmem>>, vector<32x128xbf16>
      %cst_17 = arith.constant dense<0.000000e+00> : vector<256x128xf32>
      %23 = tpu.matmul %21, %22, %cst_17 {dimension_numbers = #tpu.dot_dimension_numbers<[1], [0], [0], [1], [0, 0, 1, 1], [], []>} : vector<256x32xbf16>, vector<32x128xbf16>, vector<256x128xf32> -> vector<256x128xf32>
      %c0_18 = arith.constant 0 : index
      %c0_19 = arith.constant 0 : index
      %24 = vector.load %arg6[%c0_18, %c0_19] : memref<32x128xbf16, #tpu.memory_space<vmem>>, vector<32x128xbf16>
      %cst_20 = arith.constant dense<0.000000e+00> : vector<256x128xf32>
      %25 = tpu.matmul %20, %24, %cst_20 {dimension_numbers = #tpu.dot_dimension_numbers<[1], [0], [0], [1], [0, 0, 1, 1], [], []>} : vector<256x32xbf16>, vector<32x128xbf16>, vector<256x128xf32> -> vector<256x128xf32>
      %26 = arith.addf %23, %25 : vector<256x128xf32>
      %c0_21 = arith.constant 0 : index
      %c0_22 = arith.constant 0 : index
      %27 = vector.load %arg7[%c0_21, %c0_22] : memref<1x128xf32, #tpu.memory_space<vmem>>, vector<1x128xf32>
      %28 = vector.broadcast %27 : vector<1x128xf32> to vector<256x128xf32>
      %29 = arith.addf %26, %28 : vector<256x128xf32>
      %c0_23 = arith.constant 0 : index
      %c0_24 = arith.constant 0 : index
      %30 = vector.load %arg8[%c0_23, %c0_24] : memref<256x128xf32, #tpu.memory_space<vmem>>, vector<256x128xf32>
      tpu.vector_store %arg8[%c0_23, %c0_24], %29 {strides = array<i32>} : memref<256x128xf32, #tpu.memory_space<vmem>>, vector<256x128xf32>,
    } else {
    }
    return
  }
  func.func @transform_0(%arg0: i32, %arg1: i32) -> (i32, i32) {
    %c0_i32 = arith.constant 0 : i32
    return %arg0, %arg1 : i32, i32
  }
  func.func @transform_1(%arg0: i32, %arg1: i32) -> (i32, i32) {
    %c0_i32 = arith.constant 0 : i32
    %c0_i32_0 = arith.constant 0 : i32
    return %arg1, %c0_i32 : i32, i32
  }
  func.func @transform_2(%arg0: i32, %arg1: i32) -> (i32, i32) {
    %c0_i32 = arith.constant 0 : i32
    %c0_i32_0 = arith.constant 0 : i32
    return %arg0, %c0_i32 : i32, i32
  }
  func.func @transform_3(%arg0: i32, %arg1: i32) -> (i32, i32) {
    %c0_i32 = arith.constant 0 : i32
    %c0_i32_0 = arith.constant 0 : i32
    %c0_i32_1 = arith.constant 0 : i32
    return %c0_i32, %c0_i32_0 : i32, i32
  }
  func.func @transform_4(%arg0: i32, %arg1: i32) -> (i32, i32) {
    %c0_i32 = arith.constant 0 : i32
    %c0_i32_0 = arith.constant 0 : i32
    %c0_i32_1 = arith.constant 0 : i32
    return %c0_i32, %c0_i32_0 : i32, i32
  }
  func.func @transform_5(%arg0: i32, %arg1: i32) -> (i32, i32) {
    %c0_i32 = arith.constant 0 : i32
    %c0_i32_0 = arith.constant 0 : i32
    %c0_i32_1 = arith.constant 0 : i32
    return %c0_i32, %c0_i32_0 : i32, i32
  }
  func.func @transform_6(%arg0: i32, %arg1: i32) -> (i32, i32) {
    %c0_i32 = arith.constant 0 : i32
    %c0_i32_0 = arith.constant 0 : i32
    return %arg0, %c0_i32 : i32, i32
  }
}

</mosaic_0001>

<bundles_post_ra>
// kernel: tpu_custom_call.1
= control target key start
LH: loop header
LB: loop body
LE: loop exit
PB: predicated region body
PF: predicated region fallthrough
CT: control target
= control target key end

     0   :  { %s2378_s0 = inlined_call_operand.vmem [shape: s8[256,256], index: 0, kind: input, shape index: {}]   ;;  %s2379_s1 = inlined_call_operand.vmem [shape: bf16[256,33], index: 1, kind: input, shape index: {}]   ;;  %s2380_s2 = inlined_call_operand.vmem [shape: bf16[256,33], index: 2, kind: input, shape index: {}]   ;;  %s2381_s3 = inlined_call_operand.vmem [shape: bf16[32,128], index: 3, kind: input, shape index: {}]   ;;  %s2382_s4 = inlined_call_operand.vmem [shape: bf16[32,128], index: 4, kind: input, shape index: {}]   ;;  %s2383_s5 = inlined_call_operand.vmem [shape: f32[1,128], index: 5, kind: input, shape index: {}]   ;;  %s2384_s6 = inlined_call_operand.hbm [shape: f32[256,128], index: 6, kind: output, shape index: {}]  }
   0x1   :  { %v1781_v0 = vld [vmem:[%s2379_s1 + $0x40] sm:$0xff]   ;;  %v1783_v2 = vld [vmem:[%s2379_s1 + $0x48] sm:$0xff]   ;;  %v1785_v4 = vld [vmem:[%s2379_s1 + $0x50] sm:$0xff]  }
   0x2   :  { %v1782_v1 = vld [vmem:[%s2379_s1] sm:$0xff]   ;;  %1522 = vmatprep.subr.bf16.mxu0 %v1781_v0  ;;  %v1784_v3 = vld [vmem:[%s2379_s1 + $0x8] sm:$0xff]   ;;  %v1786_v5 = vld [vmem:[%s2379_s1 + $0x10] sm:$0xff]  }
   0x3   :  { %1523 = vmatpush3.bf16.msra.mxu0 %v1782_v1  ;;  %v1787_v6 = vld [vmem:[%s2379_s1 + $0x58] sm:$0xff]   ;;  %v1789_v8 = vld [vmem:[%s2379_s1 + $0x60] sm:$0xff]   ;;  %v1791_v10 = vld [vmem:[%s2379_s1 + $0x68] sm:$0xff]  }
   0x4   :  { %1524 = vmatprep.subr.bf16.mxu0 %v1783_v2  ;;  %v1788_v7 = vld [vmem:[%s2379_s1 + $0x18] sm:$0xff]   ;;  %v1790_v9 = vld [vmem:[%s2379_s1 + $0x20] sm:$0xff]   ;;  %v63_v11 = vld [vmem:[%s2378_s0 + $0x8] sm:$0xff] }
   0x5   :  { %v79_v12 = vunpack.c.l.s8.bf16 %v63_v11  ;;  %v1792_v13 = vld [vmem:[%s2379_s1 + $0x28] sm:$0xff]   ;;  %v1793_v14 = vld [vmem:[%s2379_s1 + $0x70] sm:$0xff]   ;;  %v1795_v16 = vld [vmem:[%s2379_s1 + $0x78] sm:$0xff]   ;;  %v81_v20 = vunpack.c.h.s8.bf16 %v63_v11 }
   0x6   :  { %v1794_v15 = vld [vmem:[%s2379_s1 + $0x30] sm:$0xff]   ;;  %v1796_v17 = vld [vmem:[%s2379_s1 + $0x38] sm:$0xff]   ;;  %v62_v18 = vld [vmem:[%s2378_s0] sm:$0xff] }
   0x7   :  { %1525 = vmatpush3.bf16.msra.mxu0 %v1784_v3  ;;  %302 = vmatprep.mubr.bf16.mxu0 %v79_v12  ;;  %v78_v19 = vunpack.c.l.s8.bf16 %v62_v18 }
   0x8   :  { %1526 = vmatprep.subr.bf16.mxu0 %v1785_v4 }
   0xb   :  { %1527 = vmatpush3.bf16.msra.mxu0 %v1786_v5 }
   0xc   :  { %1528 = vmatprep.subr.bf16.mxu0 %v1787_v6 }
   0xf   :  { %1529 = vmatpush3.bf16.msra.mxu0 %v1788_v7 }
  0x10   :  { %1530 = vmatprep.subr.bf16.mxu0 %v1789_v8 }
  0x13   :  { %1531 = vmatpush3.bf16.msra.mxu0 %v1790_v9 }
  0x14   :  { %1532 = vmatprep.subr.bf16.mxu0 %v1791_v10 }
  0x17   :  { %1533 = vmatpush3.bf16.msra.mxu0 %v1792_v13 }
  0x18   :  { %1534 = vmatprep.subr.bf16.mxu0 %v1793_v14 }
  0x1b   :  { %1535 = vmatpush3.bf16.msra.mxu0 %v1794_v15 }
  0x1c   :  { %1536 = vmatprep.subr.bf16.mxu0 %v1795_v16 }
  0x1f   :  { %1537 = vmatpush3.bf16.msra.mxu0 %v1796_v17 }
  0x22   :  { %303 = vmatmul.mubr.bf16.vlgmr.msra.gmra.mrb[0].mxu0 %v78_v19 }
  0x23   :  { %11 = vsyncpa [#allocation4], 0  ;;  %310 = vmatprep.mubr.bf16.mxu0 %v81_v20  ;;  %v65_v21 = vld [vmem:[%s2378_s0 + $0x18] sm:$0xff]  ;;  %v80_v22 = vunpack.c.h.s8.bf16 %v62_v18  ;;  %v64_v24 = vld [vmem:[%s2378_s0 + $0x10] sm:$0xff]  ;;  %vm29_vm0 = vcmask 269312   ;;  %v1905_v51 = vmov 0.0  }
  0x24   :  { %v83_v23 = vunpack.c.l.s8.bf16 %v65_v21  ;;  %v82_v25 = vunpack.c.l.s8.bf16 %v64_v24  ;;  %v85_v26 = vunpack.c.h.s8.bf16 %v65_v21  ;;  %v67_v27 = vld [vmem:[%s2378_s0 + $0x28] sm:$0xff]  ;;  %v84_v28 = vunpack.c.h.s8.bf16 %v64_v24  ;;  %v66_v30 = vld [vmem:[%s2378_s0 + $0x20] sm:$0xff]  ;;  %v69_v33 = vld [vmem:[%s2378_s0 + $0x38] sm:$0xff]  ;;  %30 = vst.msk [vmem:[#allocation2] sm:$0xff] %vm29_vm0, %v1905_v51 }
  0x25   :  { %v87_v29 = vunpack.c.l.s8.bf16 %v67_v27  ;;  %v86_v31 = vunpack.c.l.s8.bf16 %v66_v30  ;;  %v89_v32 = vunpack.c.h.s8.bf16 %v67_v27  ;;  %v88_v34 = vunpack.c.h.s8.bf16 %v66_v30  ;;  %v68_v36 = vld [vmem:[%s2378_s0 + $0x30] sm:$0xff]  ;;  %v71_v39 = vld [vmem:[%s2378_s0 + $0x48] sm:$0xff]  ;;  %v70_v42 = vld [vmem:[%s2378_s0 + $0x40] sm:$0xff]  ;;  %31 = vst.msk [vmem:[#allocation2 + $0x8] sm:$0xff] %vm29_vm0, %v1905_v51 }
  0x26   :  { %v91_v35 = vunpack.c.l.s8.bf16 %v69_v33  ;;  %v90_v37 = vunpack.c.l.s8.bf16 %v68_v36  ;;  %v93_v38 = vunpack.c.h.s8.bf16 %v69_v33  ;;  %v92_v40 = vunpack.c.h.s8.bf16 %v68_v36  ;;  %v73_v45 = vld [vmem:[%s2378_s0 + $0x58] sm:$0xff]  ;;  %v72_v48 = vld [vmem:[%s2378_s0 + $0x50] sm:$0xff]  ;;  %32 = vst.msk [vmem:[#allocation2 + $0x10] sm:$0xff] %vm29_vm0, %v1905_v51  ;;  %33 = vst.msk [vmem:[#allocation2 + $0x18] sm:$0xff] %vm29_vm0, %v1905_v51 }
  0x27   :  { %v95_v41 = vunpack.c.l.s8.bf16 %v71_v39  ;;  %v94_v43 = vunpack.c.l.s8.bf16 %v70_v42  ;;  %v97_v44 = vunpack.c.h.s8.bf16 %v71_v39  ;;  %v96_v46 = vunpack.c.h.s8.bf16 %v70_v42  ;;  %34 = vst.msk [vmem:[#allocation2 + $0x20] sm:$0xff] %vm29_vm0, %v1905_v51  ;;  %35 = vst.msk [vmem:[#allocation2 + $0x28] sm:$0xff] %vm29_vm0, %v1905_v51  ;;  %v75_v52 = vld [vmem:[%s2378_s0 + $0x68] sm:$0xff]  ;;  %v74_v55 = vld [vmem:[%s2378_s0 + $0x60] sm:$0xff] }
  0x28   :  { %v99_v47 = vunpack.c.l.s8.bf16 %v73_v45  ;;  %v98_v49 = vunpack.c.l.s8.bf16 %v72_v48  ;;  %v101_v50 = vunpack.c.h.s8.bf16 %v73_v45  ;;  %36 = vst.msk [vmem:[#allocation2 + $0x30] sm:$0xff] %vm29_vm0, %v1905_v51  ;;  %37 = vst.msk [vmem:[#allocation2 + $0x38] sm:$0xff] %vm29_vm0, %v1905_v51  ;;  %v100_v53 = vunpack.c.h.s8.bf16 %v72_v48  ;;  %v77_v58 = vld [vmem:[%s2378_s0 + $0x78] sm:$0xff]  ;;  %v76_v62 = vld [vmem:[%s2378_s0 + $0x70] sm:$0xff] }
  0x29   :  { %38 = vst.msk [vmem:[#allocation2 + $0x40] sm:$0xff] %vm29_vm0, %v1905_v51  ;;  %39 = vst.msk [vmem:[#allocation2 + $0x48] sm:$0xff] %vm29_vm0, %v1905_v51  ;;  %v103_v54 = vunpack.c.l.s8.bf16 %v75_v52  ;;  %v102_v56 = vunpack.c.l.s8.bf16 %v74_v55  ;;  %v105_v57 = vunpack.c.h.s8.bf16 %v75_v52  ;;  %v1906_v59 = vmov 32  }
  0x2a   :  { %311 = vmatmul.mubr.bf16.gmra.mrb[4].mxu0 %v80_v22  ;;  %40 = vst.msk [vmem:[#allocation2 + $0x50] sm:$0xff] %vm29_vm0, %v1905_v51  ;;  %41 = vst.msk [vmem:[#allocation2 + $0x58] sm:$0xff] %vm29_vm0, %v1905_v51  ;;  %1779 = vset.pattern.permute.xlu0 %v1906_v59  ;;  %v104_v60 = vunpack.c.h.s8.bf16 %v74_v55  ;;  %v107_v61 = vunpack.c.l.s8.bf16 %v77_v58  ;;  %v106_v63 = vunpack.c.l.s8.bf16 %v76_v62  ;;  %v109_v0 = vunpack.c.h.s8.bf16 %v77_v58 }
  0x2b   :  { %318 = vmatprep.mubr.bf16.mxu0 %v83_v23  ;;  %42 = vst.msk [vmem:[#allocation2 + $0x60] sm:$0xff] %vm29_vm0, %v1905_v51  ;;  %43 = vst.msk [vmem:[#allocation2 + $0x68] sm:$0xff] %vm29_vm0, %v1905_v51  ;;  %1780 = vset.pattern.permute.xlu1 %v1906_v59  ;;  %v108_v1 = vunpack.c.h.s8.bf16 %v76_v62  ;;  %v110_v3 = vld [vmem:[#allocation2] sm:$0xff]  ;;  %v1798_v62 = vld [vmem:[%s2382_s4 + $0x8] sm:$0xff]   ;;  %vm855_vm1 = vcmask 261120  }
  0x2c   :  { %44 = vst.msk [vmem:[#allocation2 + $0x70] sm:$0xff] %vm29_vm0, %v1905_v51  ;;  %45 = vst.msk [vmem:[#allocation2 + $0x78] sm:$0xff] %vm29_vm0, %v1905_v51  ;;  %v111_v7 = vld [vmem:[#allocation2 + $0x8] sm:$0xff] }
  0x2d   :  { %46 = vst.msk [vmem:[#allocation2 + $0x80] sm:$0xff] %vm29_vm0, %v1905_v51  ;;  %47 = vst.msk [vmem:[#allocation2 + $0x88] sm:$0xff] %vm29_vm0, %v1905_v51  ;;  %v112_v13 = vld [vmem:[#allocation2 + $0x10] sm:$0xff]  ;;  %v113_v17 = vld [vmem:[#allocation2 + $0x18] sm:$0xff] }
  0x2e   :  { %48 = vst.msk [vmem:[#allocation2 + $0x90] sm:$0xff] %vm29_vm0, %v1905_v51  ;;  %49 = vst.msk [vmem:[#allocation2 + $0x98] sm:$0xff] %vm29_vm0, %v1905_v51 }
  0x2f   :  { %50 = vst.msk [vmem:[#allocation2 + $0xa0] sm:$0xff] %vm29_vm0, %v1905_v51  ;;  %51 = vst.msk [vmem:[#allocation2 + $0xa8] sm:$0xff] %vm29_vm0, %v1905_v51  ;;  %v117_v45 = vld [vmem:[#allocation2 + $0x38] sm:$0xff] }
  0x30   :  { %52 = vst.msk [vmem:[#allocation2 + $0xb0] sm:$0xff] %vm29_vm0, %v1905_v51  ;;  %53 = vst.msk [vmem:[#allocation2 + $0xb8] sm:$0xff] %vm29_vm0, %v1905_v51  ;;  %v118_v55 = vld [vmem:[#allocation2 + $0x40] sm:$0xff] }
  0x31   :  { %54 = vst.msk [vmem:[#allocation2 + $0xc0] sm:$0xff] %vm29_vm0, %v1905_v51  ;;  %55 = vst.msk [vmem:[#allocation2 + $0xc8] sm:$0xff] %vm29_vm0, %v1905_v51 }
  0x32   :  { %319 = vmatmul.mubr.bf16.gmra.mrb[8].mxu0 %v82_v25  ;;  %56 = vst.msk [vmem:[#allocation2 + $0xd0] sm:$0xff] %vm29_vm0, %v1905_v51  ;;  %57 = vst.msk [vmem:[#allocation2 + $0xd8] sm:$0xff] %vm29_vm0, %v1905_v51 }
  0x33   :  { %326 = vmatprep.mubr.bf16.mxu0 %v85_v26  ;;  %58 = vst.msk [vmem:[#allocation2 + $0xe0] sm:$0xff] %vm29_vm0, %v1905_v51  ;;  %59 = vst.msk [vmem:[#allocation2 + $0xe8] sm:$0xff] %vm29_vm0, %v1905_v51  ;;  %v114_v26 = vld [vmem:[#allocation2 + $0x20] sm:$0xff] }
  0x34   :  { %60 = vst.msk [vmem:[#allocation2 + $0xf0] sm:$0xff] %vm29_vm0, %v1905_v51  ;;  %61 = vst.msk [vmem:[#allocation2 + $0xf8] sm:$0xff] %vm29_vm0, %v1905_v51 }
  0x3a   :  { %327 = vmatmul.mubr.bf16.gmra.mrb[12].mxu0 %v84_v28 }
  0x3b   :  { %334 = vmatprep.mubr.bf16.mxu0 %v87_v29 }
  0x42   :  { %335 = vmatmul.mubr.bf16.gmra.mrb[16].mxu0 %v86_v31  ;;  %v115_v31 = vld [vmem:[#allocation2 + $0x28] sm:$0xff] }
  0x43   :  { %342 = vmatprep.mubr.bf16.mxu0 %v89_v32 }
  0x4a   :  { %343 = vmatmul.mubr.bf16.gmra.mrb[20].mxu0 %v88_v34 }
  0x4b   :  { %350 = vmatprep.mubr.bf16.mxu0 %v91_v35 }
  0x52   :  { %351 = vmatmul.mubr.bf16.gmra.mrb[24].mxu0 %v90_v37 }
  0x53   :  { %358 = vmatprep.mubr.bf16.mxu0 %v93_v38 }
  0x5a   :  { %359 = vmatmul.mubr.bf16.gmra.mrb[28].mxu0 %v92_v40  ;;  %v116_v40 = vld [vmem:[#allocation2 + $0x30] sm:$0xff] }
  0x5b   :  { %366 = vmatprep.mubr.bf16.mxu0 %v95_v41 }
  0x62   :  { %367 = vmatmul.mubr.bf16.gmra.mrb[32].mxu0 %v94_v43 }
  0x63   :  { %374 = vmatprep.mubr.bf16.mxu0 %v97_v44 }
  0x6a   :  { %375 = vmatmul.mubr.bf16.gmra.mrb[36].mxu0 %v96_v46 }
  0x6b   :  { %382 = vmatprep.mubr.bf16.mxu0 %v99_v47 }
  0x72   :  { %383 = vmatmul.mubr.bf16.gmra.mrb[40].mxu0 %v98_v49 }
  0x73   :  { %390 = vmatprep.mubr.bf16.mxu0 %v101_v50 }
  0x7a   :  { %391 = vmatmul.mubr.bf16.gmra.mrb[44].mxu0 %v100_v53 }
  0x7b   :  { %398 = vmatprep.mubr.bf16.mxu0 %v103_v54 }
  0x82   :  { %399 = vmatmul.mubr.bf16.gmra.mrb[48].mxu0 %v102_v56 }
  0x83   :  { %406 = vmatprep.mubr.bf16.mxu0 %v105_v57  ;;  %v1797_v57 = vld [vmem:[%s2382_s4] sm:$0xff]  }
  0x84   :  { %1670 = vmatprep.subr.bf16.mxu1 %v1797_v57 }
  0x85   :  { %1671 = vmatpush3.bf16.msra.mxu1 %v1797_v57 }
  0x86   :  { %1672 = vmatprep.subr.bf16.mxu1 %v1798_v62 }
  0x89   :  { %1673 = vmatpush3.bf16.msra.mxu1 %v1798_v62 }
  0x8a   :  { %407 = vmatmul.mubr.bf16.gmra.mrb[52].mxu0 %v104_v60  ;;  %v119_v60 = vld [vmem:[#allocation2 + $0x48] sm:$0xff] }
  0x8b   :  { %414 = vmatprep.mubr.bf16.mxu0 %v107_v61 }
  0x92   :  { %415 = vmatmul.mubr.bf16.gmra.mrb[56].mxu0 %v106_v63 }
  0x93   :  { %422 = vmatprep.mubr.bf16.mxu0 %v109_v0 }
  0x9a   :  { %423 = vmatmul.mubr.bf16.gmra.mrb[60].mxu0 %v108_v1 }
  0xf5   :  { %v1538_v2 = vpop.f32.mrb[0].mxu0 }
  0xf6   :  { %v1539_v4 = vpop.f32.mrb[1].mxu0 }
  0xf7   :  { %v1540_v5 = vadd.f32 %v1539_v4, %v1538_v2  ;;  %v1541_v6 = vpop.f32.mrb[2].mxu0 }
  0xf8   :  { %v1542_v8 = vpop.f32.mrb[3].mxu0 }
  0xf9   :  { %v431_v9 = vadd.f32 %v1540_v5, %v110_v3  ;;  %v1543_v10 = vadd.f32 %v1542_v8, %v1541_v6 }
  0xfb   :  { %464 = vst.msk [vmem:[#allocation2] sm:$0xff] %vm29_vm0, %v431_v9  ;;  %v432_v11 = vadd.f32 %v1543_v10, %v111_v7  ;;  %v120_v7 = vld [vmem:[#allocation2 + $0x50] sm:$0xff] }
  0xfd   :  { %465 = vst.msk [vmem:[#allocation2 + $0x8] sm:$0xff] %vm29_vm0, %v432_v11  ;;  %v1544_v12 = vpop.f32.mrb[4].mxu0  ;;  %v121_v11 = vld [vmem:[#allocation2 + $0x58] sm:$0xff] }
  0xfe   :  { %v1545_v14 = vpop.f32.mrb[5].mxu0 }
  0xff   :  { %v1546_v15 = vadd.f32 %v1545_v14, %v1544_v12  ;;  %v1547_v16 = vpop.f32.mrb[6].mxu0 }
 0x100   :  { %v1548_v18 = vpop.f32.mrb[7].mxu0 }
 0x101   :  { %v433_v19 = vadd.f32 %v1546_v15, %v112_v13  ;;  %v1549_v20 = vadd.f32 %v1548_v18, %v1547_v16 }
 0x102   :  { %v2075_v21 = vld [vmem:[#allocation2] sm:$0xff] }
 0x103   :  { %466 = vst.msk [vmem:[#allocation2 + $0x10] sm:$0xff] %vm29_vm0, %v433_v19  ;;  %v434_v22 = vadd.f32 %v1549_v20, %v113_v17  ;;  %v531_v23 = vmax.f32 %v2075_v21, 1.0 }
 0x104   :  { %v2079_v24 = vld [vmem:[#allocation2 + $0x8] sm:$0xff] }
 0x105   :  { %467 = vst.msk [vmem:[#allocation2 + $0x18] sm:$0xff] %vm29_vm0, %v434_v22  ;;  %v1550_v25 = vpop.f32.mrb[8].mxu0  ;;  %565 = vperm.xlu0 %1779, %v531_v23   ;;  %v532_v30 = vmax.f32 %v2079_v24, 1.0  ;;  %v122_v22 = vld [vmem:[#allocation2 + $0x60] sm:$0xff] }
 0x106   :  { %v1551_v27 = vpop.f32.mrb[9].mxu0 }
 0x107   :  { %v1552_v28 = vadd.f32 %v1551_v27, %v1550_v25  ;;  %v1553_v29 = vpop.f32.mrb[10].mxu0  ;;  %v123_v27 = vld [vmem:[#allocation2 + $0x68] sm:$0xff] }
 0x108   :  { %v1554_v32 = vpop.f32.mrb[11].mxu0 }
 0x109   :  { %v435_v33 = vadd.f32 %v1552_v28, %v114_v26  ;;  %v1555_v34 = vadd.f32 %v1554_v32, %v1553_v29  ;;  %570 = vperm.xlu0 %1779, %v532_v30  }
 0x10a   :  { %v2083_v35 = vld [vmem:[#allocation2 + $0x10] sm:$0xff] }
 0x10b   :  { %468 = vst.msk [vmem:[#allocation2 + $0x20] sm:$0xff] %vm29_vm0, %v435_v33  ;;  %v436_v36 = vadd.f32 %v1555_v34, %v115_v31  ;;  %v533_v37 = vmax.f32 %v2083_v35, 1.0 }
 0x10c   :  { %v2087_v38 = vld [vmem:[#allocation2 + $0x18] sm:$0xff] }
 0x10d   :  { %469 = vst.msk [vmem:[#allocation2 + $0x28] sm:$0xff] %vm29_vm0, %v436_v36  ;;  %v1556_v39 = vpop.f32.mrb[12].mxu0  ;;  %575 = vperm.xlu1 %1780, %v533_v37   ;;  %v534_v44 = vmax.f32 %v2087_v38, 1.0 }
 0x10e   :  { %v1557_v41 = vpop.f32.mrb[13].mxu0 }
 0x10f   :  { %v1558_v42 = vadd.f32 %v1557_v41, %v1556_v39  ;;  %v1559_v43 = vpop.f32.mrb[14].mxu0  ;;  %v124_v39 = vld [vmem:[#allocation2 + $0x70] sm:$0xff] }
 0x110   :  { %v1560_v46 = vpop.f32.mrb[15].mxu0 }
 0x111   :  { %v437_v47 = vadd.f32 %v1558_v42, %v116_v40  ;;  %v1561_v48 = vadd.f32 %v1560_v46, %v1559_v43  ;;  %580 = vperm.xlu1 %1780, %v534_v44   ;;  %v125_v43 = vld [vmem:[#allocation2 + $0x78] sm:$0xff] }
 0x112   :  { %v2091_v49 = vld [vmem:[#allocation2 + $0x20] sm:$0xff] }
 0x113   :  { %470 = vst.msk [vmem:[#allocation2 + $0x30] sm:$0xff] %vm29_vm0, %v437_v47  ;;  %v438_v50 = vadd.f32 %v1561_v48, %v117_v45  ;;  %v535_v51 = vmax.f32 %v2091_v49, 1.0 }
 0x114   :  { %v2095_v52 = vld [vmem:[#allocation2 + $0x28] sm:$0xff] }
 0x115   :  { %471 = vst.msk [vmem:[#allocation2 + $0x38] sm:$0xff] %vm29_vm0, %v438_v50  ;;  %v1562_v53 = vpop.f32.mrb[16].mxu0  ;;  %585 = vperm.xlu0 %1779, %v535_v51   ;;  %v536_v54 = vmax.f32 %v2095_v52, 1.0 }
 0x116   :  { %v1563_v56 = vpop.f32.mrb[17].mxu0 }
 0x117   :  { %v1564_v58 = vadd.f32 %v1563_v56, %v1562_v53  ;;  %v1565_v59 = vpop.f32.mrb[18].mxu0  ;;  %590 = vperm.xlu1 %1780, %v536_v54  }
 0x118   :  { %v1566_v61 = vpop.f32.mrb[19].mxu0 }
 0x119   :  { %v439_v63 = vadd.f32 %v1564_v58, %v118_v55  ;;  %v1567_v0 = vadd.f32 %v1566_v61, %v1565_v59  ;;  %v126_v55 = vld [vmem:[#allocation2 + $0x80] sm:$0xff]  ;;  %v127_v59 = vld [vmem:[#allocation2 + $0x88] sm:$0xff] }
 0x11a   :  { %v2105_v1 = vld [vmem:[#allocation2 + $0x30] sm:$0xff] }
 0x11b   :  { %472 = vst.msk [vmem:[#allocation2 + $0x40] sm:$0xff] %vm29_vm0, %v439_v63  ;;  %v440_v2 = vadd.f32 %v1567_v0, %v119_v60  ;;  %v537_v3 = vmax.f32 %v2105_v1, 1.0 }
 0x11c   :  { %v2109_v4 = vld [vmem:[#allocation2 + $0x38] sm:$0xff] }
 0x11d   :  { %473 = vst.msk [vmem:[#allocation2 + $0x48] sm:$0xff] %vm29_vm0, %v440_v2  ;;  %v1568_v5 = vpop.f32.mrb[20].mxu0  ;;  %595 = vperm.xlu0 %1779, %v537_v3   ;;  %v538_v6 = vmax.f32 %v2109_v4, 1.0 }
 0x11e   :  { %v1569_v8 = vpop.f32.mrb[21].mxu0 }
 0x11f   :  { %v1570_v9 = vadd.f32 %v1569_v8, %v1568_v5  ;;  %v1571_v10 = vpop.f32.mrb[22].mxu0  ;;  %600 = vperm.xlu1 %1780, %v538_v6  }
 0x120   :  { %v1572_v12 = vpop.f32.mrb[23].mxu0 }
 0x121   :  { %v441_v13 = vadd.f32 %v1570_v9, %v120_v7  ;;  %v1573_v14 = vadd.f32 %v1572_v12, %v1571_v10  ;;  %v128_v7 = vld [vmem:[#allocation2 + $0x90] sm:$0xff] }
 0x122   :  { %v2113_v15 = vld [vmem:[#allocation2 + $0x40] sm:$0xff] }
 0x123   :  { %474 = vst.msk [vmem:[#allocation2 + $0x50] sm:$0xff] %vm29_vm0, %v441_v13  ;;  %v442_v16 = vadd.f32 %v1573_v14, %v121_v11  ;;  %v539_v17 = vmax.f32 %v2113_v15, 1.0  ;;  %v129_v11 = vld [vmem:[#allocation2 + $0x98] sm:$0xff] }
 0x124   :  { %v2117_v18 = vld [vmem:[#allocation2 + $0x48] sm:$0xff] }
 0x125   :  { %475 = vst.msk [vmem:[#allocation2 + $0x58] sm:$0xff] %vm29_vm0, %v442_v16  ;;  %v1574_v19 = vpop.f32.mrb[24].mxu0  ;;  %605 = vperm.xlu0 %1779, %v539_v17   ;;  %v540_v20 = vmax.f32 %v2117_v18, 1.0 }
 0x126   :  { %v1575_v23 = vpop.f32.mrb[25].mxu0 }
 0x127   :  { %v1576_v25 = vadd.f32 %v1575_v23, %v1574_v19  ;;  %v1577_v26 = vpop.f32.mrb[26].mxu0  ;;  %610 = vperm.xlu1 %1780, %v540_v20  }
 0x128   :  { %v1578_v28 = vpop.f32.mrb[27].mxu0 }
 0x129   :  { %v443_v29 = vadd.f32 %v1576_v25, %v122_v22  ;;  %v1579_v30 = vadd.f32 %v1578_v28, %v1577_v26  ;;  %v130_v25 = vld [vmem:[#allocation2 + $0xa0] sm:$0xff] }
 0x12a   :  { %v2121_v31 = vld [vmem:[#allocation2 + $0x50] sm:$0xff] }
 0x12b   :  { %476 = vst.msk [vmem:[#allocation2 + $0x60] sm:$0xff] %vm29_vm0, %v443_v29  ;;  %v444_v32 = vadd.f32 %v1579_v30, %v123_v27  ;;  %v541_v33 = vmax.f32 %v2121_v31, 1.0  ;;  %v131_v29 = vld [vmem:[#allocation2 + $0xa8] sm:$0xff] }
 0x12c   :  { %v2125_v34 = vld [vmem:[#allocation2 + $0x58] sm:$0xff] }
 0x12d   :  { %477 = vst.msk [vmem:[#allocation2 + $0x68] sm:$0xff] %vm29_vm0, %v444_v32  ;;  %v1580_v36 = vpop.f32.mrb[28].mxu0  ;;  %615 = vperm.xlu0 %1779, %v541_v33   ;;  %v542_v37 = vmax.f32 %v2125_v34, 1.0 }
 0x12e   :  { %v1581_v40 = vpop.f32.mrb[29].mxu0 }
 0x12f   :  { %v1582_v41 = vadd.f32 %v1581_v40, %v1580_v36  ;;  %v1583_v42 = vpop.f32.mrb[30].mxu0  ;;  %620 = vperm.xlu1 %1780, %v542_v37  }
 0x130   :  { %v1584_v44 = vpop.f32.mrb[31].mxu0 }
 0x131   :  { %v445_v45 = vadd.f32 %v1582_v41, %v124_v39  ;;  %v1585_v46 = vadd.f32 %v1584_v44, %v1583_v42 }
 0x132   :  { %v2129_v47 = vld [vmem:[#allocation2 + $0x60] sm:$0xff] }
 0x133   :  { %478 = vst.msk [vmem:[#allocation2 + $0x70] sm:$0xff] %vm29_vm0, %v445_v45  ;;  %v446_v48 = vadd.f32 %v1585_v46, %v125_v43  ;;  %v543_v50 = vmax.f32 %v2129_v47, 1.0  ;;  %v132_v43 = vld [vmem:[#allocation2 + $0xb0] sm:$0xff] }
 0x134   :  { %v2133_v51 = vld [vmem:[#allocation2 + $0x68] sm:$0xff] }
 0x135   :  { %479 = vst.msk [vmem:[#allocation2 + $0x78] sm:$0xff] %vm29_vm0, %v446_v48  ;;  %v1586_v53 = vpop.f32.mrb[32].mxu0  ;;  %625 = vperm.xlu0 %1779, %v543_v50   ;;  %v544_v54 = vmax.f32 %v2133_v51, 1.0  ;;  %v133_v48 = vld [vmem:[#allocation2 + $0xb8] sm:$0xff] }
 0x136   :  { %v1587_v56 = vpop.f32.mrb[33].mxu0 }
 0x137   :  { %v1588_v57 = vadd.f32 %v1587_v56, %v1586_v53  ;;  %v1589_v58 = vpop.f32.mrb[34].mxu0  ;;  %630 = vperm.xlu1 %1780, %v544_v54  }
 0x138   :  { %v1590_v60 = vpop.f32.mrb[35].mxu0 }
 0x139   :  { %v447_v61 = vadd.f32 %v1588_v57, %v126_v55  ;;  %v1591_v62 = vadd.f32 %v1590_v60, %v1589_v58 }
 0x13a   :  { %v2137_v63 = vld [vmem:[#allocation2 + $0x70] sm:$0xff] }
 0x13b   :  { %480 = vst.msk [vmem:[#allocation2 + $0x80] sm:$0xff] %vm29_vm0, %v447_v61  ;;  %v448_v0 = vadd.f32 %v1591_v62, %v127_v59  ;;  %v545_v2 = vmax.f32 %v2137_v63, 1.0  ;;  %v2172_v61 = vld [vmem:[%s2381_s3] sm:$0xff]  }
 0x13c   :  { %v2141_v3 = vld [vmem:[#allocation2 + $0x78] sm:$0xff]  ;;  %v134_v62 = vld [vmem:[#allocation2 + $0xc0] sm:$0xff]  ;;  %1706 = vmatprep.subr.bf16.mxu1 %v2172_v61 }
 0x13d   :  { %481 = vst.msk [vmem:[#allocation2 + $0x88] sm:$0xff] %vm29_vm0, %v448_v0  ;;  %v1592_v5 = vpop.f32.mrb[36].mxu0  ;;  %635 = vperm.xlu0 %1779, %v545_v2   ;;  %v546_v6 = vmax.f32 %v2141_v3, 1.0 }
 0x13e   :  { %v1593_v8 = vpop.f32.mrb[37].mxu0 }
 0x13f   :  { %v1594_v9 = vadd.f32 %v1593_v8, %v1592_v5  ;;  %v1595_v10 = vpop.f32.mrb[38].mxu0  ;;  %640 = vperm.xlu1 %1780, %v546_v6   ;;  %v135_v6 = vld [vmem:[#allocation2 + $0xc8] sm:$0xff] }
 0x140   :  { %v1596_v12 = vpop.f32.mrb[39].mxu0 }
 0x141   :  { %v449_v13 = vadd.f32 %v1594_v9, %v128_v7  ;;  %v1597_v14 = vadd.f32 %v1596_v12, %v1595_v10 }
 0x142   :  { %v2145_v16 = vld [vmem:[#allocation2 + $0x80] sm:$0xff] }
 0x143   :  { %482 = vst.msk [vmem:[#allocation2 + $0x90] sm:$0xff] %vm29_vm0, %v449_v13  ;;  %v450_v17 = vadd.f32 %v1597_v14, %v129_v11  ;;  %v547_v19 = vmax.f32 %v2145_v16, 1.0 }
 0x144   :  { %v2149_v20 = vld [vmem:[#allocation2 + $0x88] sm:$0xff] }
 0x145   :  { %483 = vst.msk [vmem:[#allocation2 + $0x98] sm:$0xff] %vm29_vm0, %v450_v17  ;;  %v1598_v22 = vpop.f32.mrb[40].mxu0  ;;  %645 = vperm.xlu0 %1779, %v547_v19   ;;  %v548_v23 = vmax.f32 %v2149_v20, 1.0  ;;  %v136_v19 = vld [vmem:[#allocation2 + $0xd0] sm:$0xff] }
 0x146   :  { %v1599_v26 = vpop.f32.mrb[41].mxu0 }
 0x147   :  { %v1600_v27 = vadd.f32 %v1599_v26, %v1598_v22  ;;  %v1601_v28 = vpop.f32.mrb[42].mxu0  ;;  %650 = vperm.xlu1 %1780, %v548_v23   ;;  %v137_v26 = vld [vmem:[#allocation2 + $0xd8] sm:$0xff] }
 0x148   :  { %v1602_v30 = vpop.f32.mrb[43].mxu0 }
 0x149   :  { %v451_v32 = vadd.f32 %v1600_v27, %v130_v25  ;;  %v1603_v33 = vadd.f32 %v1602_v30, %v1601_v28 }
 0x14a   :  { %v2153_v36 = vld [vmem:[#allocation2 + $0x90] sm:$0xff] }
 0x14b   :  { %484 = vst.msk [vmem:[#allocation2 + $0xa0] sm:$0xff] %vm29_vm0, %v451_v32  ;;  %v452_v37 = vadd.f32 %v1603_v33, %v131_v29  ;;  %v549_v39 = vmax.f32 %v2153_v36, 1.0 }
 0x14c   :  { %v2157_v40 = vld [vmem:[#allocation2 + $0x98] sm:$0xff] }
 0x14d   :  { %485 = vst.msk [vmem:[#allocation2 + $0xa8] sm:$0xff] %vm29_vm0, %v452_v37  ;;  %v1604_v41 = vpop.f32.mrb[44].mxu0  ;;  %655 = vperm.xlu0 %1779, %v549_v39   ;;  %v550_v42 = vmax.f32 %v2157_v40, 1.0 }
 0x14e   :  { %v1605_v44 = vpop.f32.mrb[45].mxu0 }
 0x14f   :  { %v1606_v45 = vadd.f32 %v1605_v44, %v1604_v41  ;;  %v1607_v46 = vpop.f32.mrb[46].mxu0  ;;  %660 = vperm.xlu1 %1780, %v550_v42   ;;  %v138_v42 = vld [vmem:[#allocation2 + $0xe0] sm:$0xff] }
 0x150   :  { %v1608_v50 = vpop.f32.mrb[47].mxu0 }
 0x151   :  { %v453_v53 = vadd.f32 %v1606_v45, %v132_v43  ;;  %v1609_v54 = vadd.f32 %v1608_v50, %v1607_v46  ;;  %v139_v46 = vld [vmem:[#allocation2 + $0xe8] sm:$0xff] }
 0x152   :  { %v2161_v55 = vld [vmem:[#allocation2 + $0xa0] sm:$0xff] }
 0x153   :  { %486 = vst.msk [vmem:[#allocation2 + $0xb0] sm:$0xff] %vm29_vm0, %v453_v53  ;;  %v454_v56 = vadd.f32 %v1609_v54, %v133_v48  ;;  %v551_v57 = vmax.f32 %v2161_v55, 1.0 }
 0x154   :  { %v2165_v58 = vld [vmem:[#allocation2 + $0xa8] sm:$0xff] }
 0x155   :  { %487 = vst.msk [vmem:[#allocation2 + $0xb8] sm:$0xff] %vm29_vm0, %v454_v56  ;;  %v1610_v59 = vpop.f32.mrb[48].mxu0  ;;  %665 = vperm.xlu0 %1779, %v551_v57   ;;  %v552_v60 = vmax.f32 %v2165_v58, 1.0 }
 0x156   :  { %v1611_v0 = vpop.f32.mrb[49].mxu0 }
 0x157   :  { %v1612_v2 = vadd.f32 %v1611_v0, %v1610_v59  ;;  %v1613_v5 = vpop.f32.mrb[50].mxu0  ;;  %670 = vperm.xlu1 %1780, %v552_v60   ;;  %v140_v0 = vld [vmem:[#allocation2 + $0xf0] sm:$0xff] }
 0x158   :  { %v1614_v7 = vpop.f32.mrb[51].mxu0 }
 0x159   :  { %v455_v8 = vadd.f32 %v1612_v2, %v134_v62  ;;  %v1615_v9 = vadd.f32 %v1614_v7, %v1613_v5  ;;  %v141_v7 = vld [vmem:[#allocation2 + $0xf8] sm:$0xff] }
 0x15a   :  { %v2175_v10 = vld [vmem:[#allocation2 + $0xb0] sm:$0xff] }
 0x15b   :  { %488 = vst.msk [vmem:[#allocation2 + $0xc0] sm:$0xff] %vm29_vm0, %v455_v8  ;;  %v456_v11 = vadd.f32 %v1615_v9, %v135_v6  ;;  %v553_v12 = vmax.f32 %v2175_v10, 1.0 }
 0x15c   :  { %v2179_v13 = vld [vmem:[#allocation2 + $0xb8] sm:$0xff] }
 0x15d   :  { %489 = vst.msk [vmem:[#allocation2 + $0xc8] sm:$0xff] %vm29_vm0, %v456_v11  ;;  %v1616_v14 = vpop.f32.mrb[52].mxu0  ;;  %675 = vperm.xlu0 %1779, %v553_v12   ;;  %v554_v17 = vmax.f32 %v2179_v13, 1.0 }
 0x15e   :  { %v1617_v22 = vpop.f32.mrb[53].mxu0 }
 0x15f   :  { %v1618_v23 = vadd.f32 %v1617_v22, %v1616_v14  ;;  %v1619_v25 = vpop.f32.mrb[54].mxu0  ;;  %680 = vperm.xlu1 %1780, %v554_v17  }
 0x160   :  { %v1620_v27 = vpop.f32.mrb[55].mxu0 }
 0x161   :  { %v457_v28 = vadd.f32 %v1618_v23, %v136_v19  ;;  %v1621_v29 = vadd.f32 %v1620_v27, %v1619_v25 }
 0x162   :  { %v2183_v30 = vld [vmem:[#allocation2 + $0xc0] sm:$0xff] }
 0x163   :  { %490 = vst.msk [vmem:[#allocation2 + $0xd0] sm:$0xff] %vm29_vm0, %v457_v28  ;;  %v458_v32 = vadd.f32 %v1621_v29, %v137_v26  ;;  %v555_v33 = vmax.f32 %v2183_v30, 1.0 }
 0x164   :  { %v2187_v37 = vld [vmem:[#allocation2 + $0xc8] sm:$0xff] }
 0x165   :  { %491 = vst.msk [vmem:[#allocation2 + $0xd8] sm:$0xff] %vm29_vm0, %v458_v32  ;;  %v1622_v39 = vpop.f32.mrb[56].mxu0  ;;  %685 = vperm.xlu0 %1779, %v555_v33   ;;  %v556_v41 = vmax.f32 %v2187_v37, 1.0 }
 0x166   :  { %v1623_v43 = vpop.f32.mrb[57].mxu0 }
 0x167   :  { %v1624_v44 = vadd.f32 %v1623_v43, %v1622_v39  ;;  %v1625_v45 = vpop.f32.mrb[58].mxu0  ;;  %690 = vperm.xlu1 %1780, %v556_v41  }
 0x168   :  { %v1626_v48 = vpop.f32.mrb[59].mxu0 }
 0x169   :  { %v459_v50 = vadd.f32 %v1624_v44, %v138_v42  ;;  %v1627_v53 = vadd.f32 %v1626_v48, %v1625_v45 }
 0x16a   :  { %v2191_v54 = vld [vmem:[#allocation2 + $0xd0] sm:$0xff] }
 0x16b   :  { %492 = vst.msk [vmem:[#allocation2 + $0xe0] sm:$0xff] %vm29_vm0, %v459_v50  ;;  %v460_v56 = vadd.f32 %v1627_v53, %v139_v46  ;;  %v557_v57 = vmax.f32 %v2191_v54, 1.0 }
 0x16c   :  { %v2195_v59 = vld [vmem:[#allocation2 + $0xd8] sm:$0xff] }
 0x16d   :  { %493 = vst.msk [vmem:[#allocation2 + $0xe8] sm:$0xff] %vm29_vm0, %v460_v56  ;;  %v1628_v60 = vpop.f32.mrb[60].mxu0  ;;  %695 = vperm.xlu0 %1779, %v557_v57   ;;  %v558_v62 = vmax.f32 %v2195_v59, 1.0 }
 0x16e   :  { %v1629_v2 = vpop.f32.mrb[61].mxu0 }
 0x16f   :  { %v1630_v5 = vadd.f32 %v1629_v2, %v1628_v60  ;;  %v1631_v6 = vpop.f32.mrb[62].mxu0  ;;  %700 = vperm.xlu1 %1780, %v558_v62  }
 0x170   :  { %v1632_v8 = vpop.f32.mrb[63].mxu0 }
 0x171   :  { %v461_v9 = vadd.f32 %v1630_v5, %v140_v0  ;;  %v1633_v11 = vadd.f32 %v1632_v8, %v1631_v6 }
 0x172   :  { %v2199_v12 = vld [vmem:[#allocation2 + $0xe0] sm:$0xff] }
 0x173   :  { %494 = vst.msk [vmem:[#allocation2 + $0xf0] sm:$0xff] %vm29_vm0, %v461_v9  ;;  %v462_v14 = vadd.f32 %v1633_v11, %v141_v7  ;;  %v559_v17 = vmax.f32 %v2199_v12, 1.0 }
 0x174   :  { %v2203_v19 = vld [vmem:[#allocation2 + $0xe8] sm:$0xff] }
 0x175   :  { %495 = vst.msk [vmem:[#allocation2 + $0xf8] sm:$0xff] %vm29_vm0, %v462_v14  ;;  %705 = vperm.xlu0 %1779, %v559_v17   ;;  %v560_v22 = vmax.f32 %v2203_v19, 1.0 }
 0x177   :  { %710 = vperm.xlu1 %1780, %v560_v22  }
 0x17a   :  { %v2207_v23 = vld [vmem:[#allocation2 + $0xf0] sm:$0xff] }
 0x17b   :  { %v561_v25 = vmax.f32 %v2207_v23, 1.0 }
 0x17c   :  { %v2210_v26 = vld [vmem:[#allocation2 + $0xf8] sm:$0xff] }
 0x17d   :  { %715 = vperm.xlu0 %1779, %v561_v25   ;;  %v562_v27 = vmax.f32 %v2210_v26, 1.0 }
 0x17f   :  { %720 = vperm.xlu1 %1780, %v562_v27  }
 0x184   :  { %v566_v28 = vpop.permute.xlu0 %565 }
 0x185   :  { %1817 = vrcp.f32 %v566_v28 }
 0x188   :  { %v571_v29 = vpop.permute.xlu0 %570 }
 0x189   :  { %1819 = vrcp.f32 %v571_v29 }
 0x18c   :  { %v576_v32 = vpop.permute.xlu1 %575 }
 0x18d   :  { %1821 = vrcp.f32 %v576_v32 }
 0x18f   :  { %v1818_v39 = vpop.eup %1817 }
 0x190   :  { %v581_v33 = vpop.permute.xlu1 %580  ;;  %v724_v43 = vmul.f32 %v1818_v39, %v2075_v21  ;;  %v1800_v21 = vld [vmem:[%s2381_s3 + $0x8] sm:$0xff]  }
 0x191   :  { %1823 = vrcp.f32 %v581_v33 }
 0x193   :  { %v1820_v41 = vpop.eup %1819 }
 0x194   :  { %v586_v42 = vpop.permute.xlu0 %585  ;;  %v726_v44 = vmul.f32 %v1820_v41, %v2079_v24 }
 0x195   :  { %1825 = vrcp.f32 %v586_v42 }
 0x196   :  { %v591_v45 = vpop.permute.xlu1 %590  ;;  %v787_v46 = vpack.c.bf16 %v726_v44, %v724_v43 }
 0x197   :  { %1827 = vrcp.f32 %v591_v45  ;;  %v1822_v48 = vpop.eup %1821 }
 0x198   :  { %1674 = vmatprep.mubr.msk.bf16.mxu1 %vm855_vm1, %v787_v46  ;;  %v728_v56 = vmul.f32 %v1822_v48, %v2083_v35 }
 0x19b   :  { %v1824_v50 = vpop.eup %1823 }
 0x19c   :  { %v596_v53 = vpop.permute.xlu0 %595  ;;  %v730_v57 = vmul.f32 %v1824_v50, %v2087_v38 }
 0x19d   :  { %1829 = vrcp.f32 %v596_v53 }
 0x19e   :  { %v601_v60 = vpop.permute.xlu1 %600  ;;  %v788_v62 = vpack.c.bf16 %v730_v57, %v728_v56 }
 0x19f   :  { %v1826_v24 = vpop.eup %1825  ;;  %1831 = vrcp.f32 %v601_v60 }
 0x1a0   :  { %1675 = vmatmul.mubr.msk.bf16.vlgmr.msra.gmra.mrb[0].mxu1 %vm855_vm1, %v788_v62  ;;  %v732_v2 = vmul.f32 %v1826_v24, %v2091_v49 }
 0x1a1   :  { %v1828_v0 = vpop.eup %1827  ;;  %1707 = vmatpush3.bf16.msra.mxu1 %v2172_v61 }
 0x1a2   :  { %v734_v35 = vmul.f32 %v1828_v0, %v2095_v52  ;;  %1708 = vmatprep.subr.bf16.mxu1 %v1800_v21 }
 0x1a4   :  { %v606_v38 = vpop.permute.xlu0 %605  ;;  %v789_v5 = vpack.c.bf16 %v734_v35, %v732_v2 }
 0x1a5   :  { %1833 = vrcp.f32 %v606_v38  ;;  %1709 = vmatpush3.bf16.msra.mxu1 %v1800_v21 }
 0x1a6   :  { %v611_v6 = vpop.permute.xlu1 %610  ;;  %1678 = vmatprep.mubr.msk.bf16.mxu1 %vm855_vm1, %v789_v5 }
 0x1a7   :  { %v1830_v7 = vpop.eup %1829  ;;  %1835 = vrcp.f32 %v611_v6 }
 0x1a8   :  { %v736_v9 = vmul.f32 %v1830_v7, %v2105_v1 }
 0x1a9   :  { %v1832_v8 = vpop.eup %1831 }
 0x1aa   :  { %v738_v11 = vmul.f32 %v1832_v8, %v2109_v4 }
 0x1ac   :  { %v616_v61 = vpop.permute.xlu0 %615  ;;  %v790_v14 = vpack.c.bf16 %v738_v11, %v736_v9 }
 0x1ad   :  { %1837 = vrcp.f32 %v616_v61 }
 0x1ae   :  { %v621_v49 = vpop.permute.xlu1 %620  ;;  %1679 = vmatmul.mubr.msk.bf16.gmra.mrb[4].mxu1 %vm855_vm1, %v790_v14 }
 0x1af   :  { %v1834_v52 = vpop.eup %1833  ;;  %1839 = vrcp.f32 %v621_v49 }
 0x1b0   :  { %v740_v22 = vmul.f32 %v1834_v52, %v2113_v15 }
 0x1b1   :  { %v1836_v17 = vpop.eup %1835 }
 0x1b2   :  { %v742_v25 = vmul.f32 %v1836_v17, %v2117_v18 }
 0x1b4   :  { %v626_v27 = vpop.permute.xlu0 %625  ;;  %v791_v28 = vpack.c.bf16 %v742_v25, %v740_v22 }
 0x1b5   :  { %1841 = vrcp.f32 %v626_v27 }
 0x1b6   :  { %v631_v29 = vpop.permute.xlu1 %630  ;;  %1682 = vmatprep.mubr.msk.bf16.mxu1 %vm855_vm1, %v791_v28 }
 0x1b7   :  { %v1838_v1 = vpop.eup %1837  ;;  %1843 = vrcp.f32 %v631_v29 }
 0x1b8   :  { %v744_v32 = vmul.f32 %v1838_v1, %v2121_v31 }
 0x1b9   :  { %v1840_v4 = vpop.eup %1839 }
 0x1ba   :  { %v746_v33 = vmul.f32 %v1840_v4, %v2125_v34 }
 0x1bc   :  { %v636_v39 = vpop.permute.xlu0 %635  ;;  %v792_v41 = vpack.c.bf16 %v746_v33, %v744_v32 }
 0x1bd   :  { %1845 = vrcp.f32 %v636_v39 }
 0x1be   :  { %v641_v42 = vpop.permute.xlu1 %640  ;;  %1683 = vmatmul.mubr.msk.bf16.gmra.mrb[8].mxu1 %vm855_vm1, %v792_v41 }
 0x1bf   :  { %v1842_v15 = vpop.eup %1841  ;;  %1847 = vrcp.f32 %v641_v42 }
 0x1c0   :  { %v748_v43 = vmul.f32 %v1842_v15, %v2129_v47 }
 0x1c1   :  { %v1844_v18 = vpop.eup %1843 }
 0x1c2   :  { %v750_v44 = vmul.f32 %v1844_v18, %v2133_v51 }
 0x1c4   :  { %v646_v45 = vpop.permute.xlu0 %645  ;;  %v793_v46 = vpack.c.bf16 %v750_v44, %v748_v43 }
 0x1c5   :  { %1849 = vrcp.f32 %v646_v45 }
 0x1c6   :  { %v651_v48 = vpop.permute.xlu1 %650  ;;  %1686 = vmatprep.mubr.msk.bf16.mxu1 %vm855_vm1, %v793_v46  ;;  %v1801_v46 = vld [vmem:[%s2380_s2] sm:$0xff]  }
 0x1c7   :  { %v1846_v31 = vpop.eup %1845  ;;  %1851 = vrcp.f32 %v651_v48 }
 0x1c8   :  { %v752_v50 = vmul.f32 %v1846_v31, %v2137_v63  ;;  %v1806_v31 = vld [vmem:[%s2380_s2 + $0x28] sm:$0xff]  }
 0x1c9   :  { %v1848_v34 = vpop.eup %1847 }
 0x1ca   :  { %v754_v53 = vmul.f32 %v1848_v34, %v2141_v3  ;;  %v1807_v34 = vld [vmem:[%s2380_s2 + $0x30] sm:$0xff]  }
 0x1cc   :  { %v656_v56 = vpop.permute.xlu0 %655  ;;  %v794_v57 = vpack.c.bf16 %v754_v53, %v752_v50  ;;  %v1808_v50 = vld [vmem:[%s2380_s2 + $0x38] sm:$0xff]   ;;  %v1809_v53 = vld [vmem:[%s2380_s2 + $0x40] sm:$0xff]  }
 0x1cd   :  { %1853 = vrcp.f32 %v656_v56  ;;  %v1810_v56 = vld [vmem:[%s2380_s2 + $0x48] sm:$0xff]  }
 0x1ce   :  { %v661_v60 = vpop.permute.xlu1 %660  ;;  %1687 = vmatmul.mubr.msk.bf16.gmra.mrb[12].mxu1 %vm855_vm1, %v794_v57  ;;  %v1811_v57 = vld [vmem:[%s2380_s2 + $0x50] sm:$0xff]  }
 0x1cf   :  { %v1850_v47 = vpop.eup %1849  ;;  %1855 = vrcp.f32 %v661_v60  ;;  %v1812_v60 = vld [vmem:[%s2380_s2 + $0x58] sm:$0xff]  }
 0x1d0   :  { %v756_v62 = vmul.f32 %v1850_v47, %v2145_v16  ;;  %v1813_v47 = vld [vmem:[%s2380_s2 + $0x60] sm:$0xff]  }
 0x1d1   :  { %v1852_v51 = vpop.eup %1851 }
 0x1d2   :  { %v758_v21 = vmul.f32 %v1852_v51, %v2149_v20  ;;  %v1814_v51 = vld [vmem:[%s2380_s2 + $0x68] sm:$0xff]  }
 0x1d4   :  { %v666_v24 = vpop.permute.xlu0 %665  ;;  %v795_v0 = vpack.c.bf16 %v758_v21, %v756_v62  ;;  %v1815_v62 = vld [vmem:[%s2380_s2 + $0x70] sm:$0xff]   ;;  %v1816_v21 = vld [vmem:[%s2380_s2 + $0x78] sm:$0xff]  }
 0x1d5   :  { %1857 = vrcp.f32 %v666_v24  ;;  %v2332_v24 = vld [vmem:[%s2383_s5] ss:$0 sm:$0xff] }
 0x1d6   :  { %v671_v2 = vpop.permute.xlu1 %670  ;;  %1690 = vmatprep.mubr.msk.bf16.mxu1 %vm855_vm1, %v795_v0 }
 0x1d7   :  { %v1854_v63 = vpop.eup %1853  ;;  %1859 = vrcp.f32 %v671_v2 }
 0x1d8   :  { %v760_v35 = vmul.f32 %v1854_v63, %v2153_v36 }
 0x1d9   :  { %v1856_v3 = vpop.eup %1855 }
 0x1da   :  { %v762_v38 = vmul.f32 %v1856_v3, %v2157_v40 }
 0x1dc   :  { %v676_v5 = vpop.permute.xlu0 %675  ;;  %v796_v6 = vpack.c.bf16 %v762_v38, %v760_v35 }
 0x1dd   :  { %1861 = vrcp.f32 %v676_v5 }
 0x1de   :  { %v681_v7 = vpop.permute.xlu1 %680  ;;  %1691 = vmatmul.mubr.msk.bf16.gmra.mrb[16].mxu1 %vm855_vm1, %v796_v6 }
 0x1df   :  { %v1858_v16 = vpop.eup %1857  ;;  %1863 = vrcp.f32 %v681_v7 }
 0x1e0   :  { %v764_v8 = vmul.f32 %v1858_v16, %v2161_v55 }
 0x1e1   :  { %v1860_v20 = vpop.eup %1859 }
 0x1e2   :  { %v766_v9 = vmul.f32 %v1860_v20, %v2165_v58 }
 0x1e4   :  { %v686_v11 = vpop.permute.xlu0 %685  ;;  %v797_v61 = vpack.c.bf16 %v766_v9, %v764_v8 }
 0x1e5   :  { %1865 = vrcp.f32 %v686_v11 }
 0x1e6   :  { %v691_v14 = vpop.permute.xlu1 %690  ;;  %1694 = vmatprep.mubr.msk.bf16.mxu1 %vm855_vm1, %v797_v61 }
 0x1e7   :  { %v1862_v36 = vpop.eup %1861  ;;  %1867 = vrcp.f32 %v691_v14 }
 0x1e8   :  { %v768_v49 = vmul.f32 %v1862_v36, %v2175_v10 }
 0x1e9   :  { %v1864_v40 = vpop.eup %1863 }
 0x1ea   :  { %v770_v52 = vmul.f32 %v1864_v40, %v2179_v13 }
 0x1ec   :  { %v696_v17 = vpop.permute.xlu0 %695  ;;  %v798_v22 = vpack.c.bf16 %v770_v52, %v768_v49 }
 0x1ed   :  { %1869 = vrcp.f32 %v696_v17 }
 0x1ee   :  { %v701_v25 = vpop.permute.xlu1 %700  ;;  %1695 = vmatmul.mubr.msk.bf16.gmra.mrb[20].mxu1 %vm855_vm1, %v798_v22 }
 0x1ef   :  { %v1866_v55 = vpop.eup %1865  ;;  %1871 = vrcp.f32 %v701_v25 }
 0x1f0   :  { %v772_v27 = vmul.f32 %v1866_v55, %v2183_v30 }
 0x1f1   :  { %v1868_v58 = vpop.eup %1867 }
 0x1f2   :  { %v774_v28 = vmul.f32 %v1868_v58, %v2187_v37 }
 0x1f4   :  { %v706_v29 = vpop.permute.xlu0 %705  ;;  %v799_v1 = vpack.c.bf16 %v774_v28, %v772_v27 }
 0x1f5   :  { %1873 = vrcp.f32 %v706_v29 }
 0x1f6   :  { %v711_v4 = vpop.permute.xlu1 %710  ;;  %1698 = vmatprep.mubr.msk.bf16.mxu1 %vm855_vm1, %v799_v1 }
 0x1f7   :  { %v1870_v10 = vpop.eup %1869  ;;  %1875 = vrcp.f32 %v711_v4 }
 0x1f8   :  { %v776_v32 = vmul.f32 %v1870_v10, %v2191_v54 }
 0x1f9   :  { %v1872_v13 = vpop.eup %1871 }
 0x1fa   :  { %v778_v33 = vmul.f32 %v1872_v13, %v2195_v59 }
 0x1fc   :  { %v716_v39 = vpop.permute.xlu0 %715  ;;  %v800_v41 = vpack.c.bf16 %v778_v33, %v776_v32 }
 0x1fd   :  { %1877 = vrcp.f32 %v716_v39 }
 0x1fe   :  { %v721_v42 = vpop.permute.xlu1 %720  ;;  %1699 = vmatmul.mubr.msk.bf16.gmra.mrb[24].mxu1 %vm855_vm1, %v800_v41 }
 0x1ff   :  { %v1874_v30 = vpop.eup %1873  ;;  %1879 = vrcp.f32 %v721_v42 }
 0x200   :  { %v780_v15 = vmul.f32 %v1874_v30, %v2199_v12  ;;  %v1802_v12 = vld [vmem:[%s2380_s2 + $0x8] sm:$0xff]  }
 0x201   :  { %v1876_v37 = vpop.eup %1875 }
 0x202   :  { %v782_v18 = vmul.f32 %v1876_v37, %v2203_v19  ;;  %v1803_v19 = vld [vmem:[%s2380_s2 + $0x10] sm:$0xff]  }
 0x204   :  { %v801_v43 = vpack.c.bf16 %v782_v18, %v780_v15 }
 0x206   :  { %1702 = vmatprep.mubr.msk.bf16.mxu1 %vm855_vm1, %v801_v43 }
 0x207   :  { %v1878_v44 = vpop.eup %1877 }
 0x208   :  { %v784_v59 = vmul.f32 %v1878_v44, %v2207_v23  ;;  %v1804_v23 = vld [vmem:[%s2380_s2 + $0x18] sm:$0xff]  }
 0x209   :  { %v1880_v54 = vpop.eup %1879 }
 0x20a   :  { %v786_v45 = vmul.f32 %v1880_v54, %v2210_v26  ;;  %v1805_v26 = vld [vmem:[%s2380_s2 + $0x20] sm:$0xff]   ;;  %s1907_s2 = smov [#allocation3]  }
 0x20b   :  { %s1442_s5 = sshll.u32 %s1907_s2, 4  ;;  %s1443_s5 = int_to_ptr.vmem [resolvable:$true] %s1442_s5 }
 0x20c   :  { %v802_v48 = vpack.c.bf16 %v786_v45, %v784_v59  ;;  %s1881_s22 = scalar_lea.vmem %s1443_s5, 4096  ;;  %p1886_p1 = scmp.lt.s32.totalorder %s1443_s5, %s1443_s5 }
 0x20d   :  { %p1882_p0 = scmp.ne.s32.totalorder %s1443_s5, %s1881_s22  ;;  %p1887_p2 = scmp.lt.s32.totalorder %s1881_s22, %s1881_s22 }
 0x20e   :  { %1703 = vmatmul.mubr.msk.bf16.gmra.mrb[28].mxu1 %vm855_vm1, %v802_v48 }
 0x20f   :  { %1710 = vmatprep.mubr.msk.bf16.mxu1 %vm855_vm1, %v1801_v46  ;;  %p1888_p3 = por %p1887_p2, %p1886_p1 }
 0x211   :  { %p1889_p4 = pnand %p1888_p3, %p1882_p0 }
 0x216   :  { %1711 = vmatmul.mubr.msk.bf16.vlgmr.msra.gmra.mrb[0].mxu1 %vm855_vm1, %v1802_v12 }
 0x217   :  { %1714 = vmatprep.mubr.msk.bf16.mxu1 %vm855_vm1, %v1803_v19 }
 0x21e   :  { %1715 = vmatmul.mubr.msk.bf16.gmra.mrb[4].mxu1 %vm855_vm1, %v1804_v23 }
 0x21f   :  { %1718 = vmatprep.mubr.msk.bf16.mxu1 %vm855_vm1, %v1805_v26 }
 0x226   :  { %1719 = vmatmul.mubr.msk.bf16.gmra.mrb[8].mxu1 %vm855_vm1, %v1806_v31 }
 0x227   :  { %1722 = vmatprep.mubr.msk.bf16.mxu1 %vm855_vm1, %v1807_v34 }
 0x22e   :  { %1723 = vmatmul.mubr.msk.bf16.gmra.mrb[12].mxu1 %vm855_vm1, %v1808_v50 }
 0x22f   :  { %1726 = vmatprep.mubr.msk.bf16.mxu1 %vm855_vm1, %v1809_v53 }
 0x236   :  { %1727 = vmatmul.mubr.msk.bf16.gmra.mrb[16].mxu1 %vm855_vm1, %v1810_v56 }
 0x237   :  { %1730 = vmatprep.mubr.msk.bf16.mxu1 %vm855_vm1, %v1811_v57 }
 0x23e   :  { %1731 = vmatmul.mubr.msk.bf16.gmra.mrb[20].mxu1 %vm855_vm1, %v1812_v60 }
 0x23f   :  { %1734 = vmatprep.mubr.msk.bf16.mxu1 %vm855_vm1, %v1813_v47 }
 0x246   :  { %1735 = vmatmul.mubr.msk.bf16.gmra.mrb[24].mxu1 %vm855_vm1, %v1814_v51 }
 0x247   :  { %1738 = vmatprep.mubr.msk.bf16.mxu1 %vm855_vm1, %v1815_v62 }
 0x24e   :  { %1739 = vmatmul.mubr.msk.bf16.gmra.mrb[28].mxu1 %vm855_vm1, %v1816_v21 }
 0x2e9   :  { %v1712_v0 = vpop.f32.mrb[0].mxu1 }
 0x2ea   :  { %v1375_v2 = vadd.f32 %v1712_v0, %v2332_v24  ;;  %v1239_v63 = vpop.f32.mrb[1].mxu1 }
 0x2eb   :  { %v1373_v3 = vadd.f32 %v2332_v24, %v1239_v63  ;;  %v1713_v35 = vpop.f32.mrb[2].mxu1 }
 0x2ec   :  { %1407 = vst [vmem:[#allocation3 + $0x10] sm:$0xff] %v1375_v2  ;;  %v1376_v38 = vadd.f32 %v1713_v35, %v2332_v24  ;;  %v1242_v5 = vpop.f32.mrb[3].mxu1 }
 0x2ed   :  { %1405 = vst [vmem:[#allocation3] sm:$0xff] %v1373_v3  ;;  %v1374_v6 = vadd.f32 %v2332_v24, %v1242_v5 }
 0x2ee   :  { %1408 = vst [vmem:[#allocation3 + $0x18] sm:$0xff] %v1376_v38 }
 0x2ef   :  { %1406 = vst [vmem:[#allocation3 + $0x8] sm:$0xff] %v1374_v6 }
 0x2f1   :  { %v1716_v7 = vpop.f32.mrb[4].mxu1 }
 0x2f2   :  { %v1379_v16 = vadd.f32 %v1716_v7, %v2332_v24  ;;  %v1255_v20 = vpop.f32.mrb[5].mxu1 }
 0x2f3   :  { %v1377_v8 = vadd.f32 %v2332_v24, %v1255_v20  ;;  %v1717_v9 = vpop.f32.mrb[6].mxu1 }
 0x2f4   :  { %1411 = vst [vmem:[#allocation3 + $0x30] sm:$0xff] %v1379_v16  ;;  %v1380_v11 = vadd.f32 %v1717_v9, %v2332_v24  ;;  %v1258_v61 = vpop.f32.mrb[7].mxu1 }
 0x2f5   :  { %1409 = vst [vmem:[#allocation3 + $0x20] sm:$0xff] %v1377_v8  ;;  %v1378_v14 = vadd.f32 %v2332_v24, %v1258_v61 }
 0x2f6   :  { %1412 = vst [vmem:[#allocation3 + $0x38] sm:$0xff] %v1380_v11 }
 0x2f7   :  { %1410 = vst [vmem:[#allocation3 + $0x28] sm:$0xff] %v1378_v14 }
 0x2f9   :  { %v1720_v36 = vpop.f32.mrb[8].mxu1 }
 0x2fa   :  { %v1383_v40 = vadd.f32 %v1720_v36, %v2332_v24  ;;  %v1271_v49 = vpop.f32.mrb[9].mxu1 }
 0x2fb   :  { %v1381_v52 = vadd.f32 %v2332_v24, %v1271_v49  ;;  %v1721_v17 = vpop.f32.mrb[10].mxu1 }
 0x2fc   :  { %1415 = vst [vmem:[#allocation3 + $0x50] sm:$0xff] %v1383_v40  ;;  %v1384_v22 = vadd.f32 %v1721_v17, %v2332_v24  ;;  %v1274_v25 = vpop.f32.mrb[11].mxu1 }
 0x2fd   :  { %1413 = vst [vmem:[#allocation3 + $0x40] sm:$0xff] %v1381_v52  ;;  %v1382_v55 = vadd.f32 %v2332_v24, %v1274_v25 }
 0x2fe   :  { %1416 = vst [vmem:[#allocation3 + $0x58] sm:$0xff] %v1384_v22 }
 0x2ff   :  { %1414 = vst [vmem:[#allocation3 + $0x48] sm:$0xff] %v1382_v55 }
 0x301   :  { %v1724_v58 = vpop.f32.mrb[12].mxu1 }
 0x302   :  { %v1387_v27 = vadd.f32 %v1724_v58, %v2332_v24  ;;  %v1287_v28 = vpop.f32.mrb[13].mxu1 }
 0x303   :  { %v1385_v29 = vadd.f32 %v2332_v24, %v1287_v28  ;;  %v1725_v1 = vpop.f32.mrb[14].mxu1 }
 0x304   :  { %1419 = vst [vmem:[#allocation3 + $0x70] sm:$0xff] %v1387_v27  ;;  %v1388_v4 = vadd.f32 %v1725_v1, %v2332_v24  ;;  %v1290_v10 = vpop.f32.mrb[15].mxu1 }
 0x305   :  { %1417 = vst [vmem:[#allocation3 + $0x60] sm:$0xff] %v1385_v29  ;;  %v1386_v13 = vadd.f32 %v2332_v24, %v1290_v10 }
 0x306   :  { %1420 = vst [vmem:[#allocation3 + $0x78] sm:$0xff] %v1388_v4 }
 0x307   :  { %1418 = vst [vmem:[#allocation3 + $0x68] sm:$0xff] %v1386_v13 }
 0x309   :  { %v1728_v32 = vpop.f32.mrb[16].mxu1 }
 0x30a   :  { %v1391_v33 = vadd.f32 %v1728_v32, %v2332_v24  ;;  %v1303_v39 = vpop.f32.mrb[17].mxu1 }
 0x30b   :  { %v1389_v41 = vadd.f32 %v2332_v24, %v1303_v39  ;;  %v1729_v42 = vpop.f32.mrb[18].mxu1 }
 0x30c   :  { %1423 = vst [vmem:[#allocation3 + $0x90] sm:$0xff] %v1391_v33  ;;  %v1392_v30 = vadd.f32 %v1729_v42, %v2332_v24  ;;  %v1306_v37 = vpop.f32.mrb[19].mxu1 }
 0x30d   :  { %1421 = vst [vmem:[#allocation3 + $0x80] sm:$0xff] %v1389_v41  ;;  %v1390_v15 = vadd.f32 %v2332_v24, %v1306_v37 }
 0x30e   :  { %1424 = vst [vmem:[#allocation3 + $0x98] sm:$0xff] %v1392_v30 }
 0x30f   :  { %1422 = vst [vmem:[#allocation3 + $0x88] sm:$0xff] %v1390_v15 }
 0x311   :  { %v1732_v18 = vpop.f32.mrb[20].mxu1 }
 0x312   :  { %v1395_v43 = vadd.f32 %v1732_v18, %v2332_v24  ;;  %v1319_v44 = vpop.f32.mrb[21].mxu1 }
 0x313   :  { %v1393_v54 = vadd.f32 %v2332_v24, %v1319_v44  ;;  %v1733_v59 = vpop.f32.mrb[22].mxu1 }
 0x314   :  { %1427 = vst [vmem:[#allocation3 + $0xb0] sm:$0xff] %v1395_v43  ;;  %v1396_v45 = vadd.f32 %v1733_v59, %v2332_v24  ;;  %v1322_v46 = vpop.f32.mrb[23].mxu1 }
 0x315   :  { %1425 = vst [vmem:[#allocation3 + $0xa0] sm:$0xff] %v1393_v54  ;;  %v1394_v48 = vadd.f32 %v2332_v24, %v1322_v46 }
 0x316   :  { %1428 = vst [vmem:[#allocation3 + $0xb8] sm:$0xff] %v1396_v45 }
 0x317   :  { %1426 = vst [vmem:[#allocation3 + $0xa8] sm:$0xff] %v1394_v48 }
 0x319   :  { %v1736_v12 = vpop.f32.mrb[24].mxu1 }
 0x31a   :  { %v1399_v19 = vadd.f32 %v1736_v12, %v2332_v24  ;;  %v1335_v23 = vpop.f32.mrb[25].mxu1 }
 0x31b   :  { %v1397_v26 = vadd.f32 %v2332_v24, %v1335_v23  ;;  %v1737_v31 = vpop.f32.mrb[26].mxu1 }
 0x31c   :  { %1431 = vst [vmem:[#allocation3 + $0xd0] sm:$0xff] %v1399_v19  ;;  %v1400_v34 = vadd.f32 %v1737_v31, %v2332_v24  ;;  %v1338_v50 = vpop.f32.mrb[27].mxu1 }
 0x31d   :  { %1429 = vst [vmem:[#allocation3 + $0xc0] sm:$0xff] %v1397_v26  ;;  %v1398_v53 = vadd.f32 %v2332_v24, %v1338_v50 }
 0x31e   :  { %1432 = vst [vmem:[#allocation3 + $0xd8] sm:$0xff] %v1400_v34 }
 0x31f   :  { %1430 = vst [vmem:[#allocation3 + $0xc8] sm:$0xff] %v1398_v53 }
 0x321   :  { %v1740_v56 = vpop.f32.mrb[28].mxu1 }
 0x322   :  { %v1403_v57 = vadd.f32 %v1740_v56, %v2332_v24  ;;  %v1351_v60 = vpop.f32.mrb[29].mxu1 }
 0x323   :  { %v1401_v47 = vadd.f32 %v2332_v24, %v1351_v60  ;;  %v1741_v51 = vpop.f32.mrb[30].mxu1 }
 0x324   :  { %1435 = vst [vmem:[#allocation3 + $0xf0] sm:$0xff] %v1403_v57  ;;  %v1404_v62 = vadd.f32 %v1741_v51, %v2332_v24  ;;  %v1354_v21 = vpop.f32.mrb[31].mxu1 }
 0x325   :  { %1433 = vst [vmem:[#allocation3 + $0xe0] sm:$0xff] %v1401_v47  ;;  %v1402_v0 = vadd.f32 %v2332_v24, %v1354_v21 }
 0x326   :  { %1436 = vst [vmem:[#allocation3 + $0xf8] sm:$0xff] %v1404_v62 }
 0x327   :  { %1434 = vst [vmem:[#allocation3 + $0xe8] sm:$0xff] %v1402_v0 }
 0x328   :  { %1892 = shalt.err (!%p1889_p4)
}
 0x329   :  { %s1893_s25 = scalar_lea.hbm %s2384_s6, 4096 }
 0x32a   :  { %p1894_p5 = scmp.ne.s32.totalorder %s2384_s6, %s1893_s25  ;;  %p1897_p6 = scmp.lt.u32.totalorder %s1893_s25, %s2384_s6 }
 0x32c   :  { %p1899_p7 = pnand %p1897_p6, %p1894_p5 }
 0x32e   :  { %1902 = shalt.err (!%p1899_p7)
}
 0x32f   :  { %s1908_s30 = smov 128   ;;  %s1909_s7 = smov 8  }
 0x330   :  { %1448 = dma.vmem_to_hbm [thread:$0]  %s1443_s5, 4096, %s2384_s6, [#allocation4], %s1908_s30, %s1908_s30, %s1909_s7  }
 0x331   :  { %1903 = dma.done.wait [#allocation4], 4096  }
 0x332   :  { %1904 = vsyncadd [#allocation4], 4294963200 }
 0x333   :  { %1452 = vsyncpa [#allocation4], 1 }

</bundles_post_ra>
